<compile_context>
chip_gen: v7x
topology: tpu7x:2x2x1
jax: 0.10.0
libtpu: 0.0.40
codegen_flags: <defaults>
</compile_context>

<pallas_src>
import jax
import jax.numpy as jnp
from jax.experimental import pallas as pl
from jax.experimental.pallas import tpu as pltpu

_LANE = 128
_SUBLANE = 8
_VMEM_LIMIT = 32 * 1024 * 1024


# ----------------------------------------------------------------------------
# tiling helpers
# ----------------------------------------------------------------------------
def _pick_divisor_tile(n, max_tile, align):
    """Largest divisor of n that is <= max_tile and a multiple of `align`.
    Falls back to n itself (full extent is always a legal block dim)."""
    if n <= max_tile:
        return n
    for t in range(min(max_tile, n), 0, -1):
        if n % t == 0 and t % align == 0:
            return t
    return n


def _pick_batch_tile(b, block_bytes, target_bytes):
    """Smallest divisor of b whose packed block reaches ~target_bytes
    (amortizes the ~0.35us per-grid-step overhead for tiny feature maps)."""
    for d in range(1, b + 1):
        if b % d == 0 and d * block_bytes >= target_bytes:
            return d
    return b


def _largest_proper_divisor(n):
    for d in range(n // 2, 0, -1):
        if n % d == 0:
            return d
    return 1


def _largest_aligned_proper_divisor(n, align):
    for d in range(n // 2, 0, -1):
        if n % d == 0 and d % align == 0:
            return d
    return None


# ----------------------------------------------------------------------------
# fused single-call path (x resident in VMEM: 1 HBM read + 1 write)
# ----------------------------------------------------------------------------
def _se_fused(x, w1, b1, alpha, w2, b2, out_dtype):
    B, C, H, W = x.shape
    HW = H * W
    inv_hw = float(1.0 / HW)

    x3 = x.reshape(B, C, HW)                         # contiguous view, no copy
    w1t = jnp.asarray(w1, jnp.float32).T             # (C, Cr)
    w2t = jnp.asarray(w2, jnp.float32).T             # (Cr, C)
    b1r = jnp.asarray(b1, jnp.float32).reshape(1, -1)
    b2r = jnp.asarray(b2, jnp.float32).reshape(1, -1)
    a11 = jnp.asarray(alpha, jnp.float32).reshape(1, 1)

    def kernel(x_ref, w1t_ref, b1_ref, a_ref, w2t_ref, b2_ref, o_ref):
        xv = x_ref[...].astype(jnp.float32)                       # (B, C, HW)
        y = jnp.sum(xv, axis=-1) * inv_hw                         # (B, C)
        # Tiny excitation MLP in exact f32 on the VPU/XLU (broadcast-multiply
        # + sublane reduce); keeps the result faithful to PyTorch f32 Linear.
        z1 = jnp.sum(y[:, :, None] * w1t_ref[...][None, :, :], axis=1)
        z1 = z1 + b1_ref[...]                                     # (B, Cr)
        z1 = jnp.where(z1 > 0, z1, a_ref[...] * z1)               # scalar PReLU
        z2 = jnp.sum(z1[:, :, None] * w2t_ref[...][None, :, :], axis=1)
        z2 = z2 + b2_ref[...]                                     # (B, C)
        gate = 1.0 / (1.0 + jnp.exp(-z2))                         # sigmoid (EUP)
        o_ref[...] = (xv * gate[:, :, None]).astype(o_ref.dtype)

    vm = pltpu.MemorySpace.VMEM
    out3 = pl.pallas_call(
        kernel,
        out_shape=jax.ShapeDtypeStruct((B, C, HW), out_dtype),
        in_specs=[pl.BlockSpec(memory_space=vm),    # x3
                  pl.BlockSpec(memory_space=vm),    # w1t
                  pl.BlockSpec(memory_space=vm),    # b1 (1, Cr)
                  pl.BlockSpec(memory_space=vm),    # alpha (1, 1)
                  pl.BlockSpec(memory_space=vm),    # w2t
                  pl.BlockSpec(memory_space=vm)],   # b2 (1, C)
        out_specs=pl.BlockSpec(memory_space=vm),
        compiler_params=pltpu.CompilerParams(vmem_limit_bytes=_VMEM_LIMIT),
    )(x3, w1t, b1r, a11, w2t, b2r)
    return out3.reshape(B, C, H, W)


# ----------------------------------------------------------------------------
# general tiled 3-pass path
# ----------------------------------------------------------------------------
def _se_tiled(x, w1, b1, alpha, w2, b2, out_dtype,
              max_lane_tile, max_block_bytes, batch_pack_bytes):
    assert max_lane_tile % _LANE == 0
    B, C, H, W = x.shape
    HW = H * W

    # Fold a channel subfactor into the lane axis when the feature map is a
    # small power-of-two divisor of 128 -> dense multiple-of-128 lane blocks.
    k = 1
    if HW < _LANE and _LANE % HW == 0 and C % (_LANE // HW) == 0:
        k = _LANE // HW
    CG = C // k                 # channel groups (sublane axis)
    L = k * HW                  # lane axis per (batch, channel-group) row
    x3 = x.reshape(B, CG, L)    # pure reshape of the NCHW buffer (no copy)

    # Lane (spatial) tiling.  Ragged tails only occur when k == 1 (k > 1
    # implies L == 128 <= max_lane_tile).
    TL = L if L <= max_lane_tile else max_lane_tile
    n_lt = pl.cdiv(L, TL)
    ragged = (L % TL) != 0
    seg = TL // k               # spatial segment per folded channel

    itemsize = x.dtype.itemsize
    max_tcg = max(_SUBLANE, max_block_bytes // (TL * itemsize))
    TCG = _pick_divisor_tile(CG, max_tcg, _SUBLANE)
    TB = _pick_batch_tile(B, TCG * TL * itemsize, batch_pack_bytes)

    # Keep >= 2 blocks along a "parallel" grid axis so both v7x TensorCores
    # get work (no effect on single-TC v5e/v6e).
    if (B // TB) * (CG // TCG) == 1:
        if B > 1:
            TB = _largest_proper_divisor(B)
        else:
            d = _largest_aligned_proper_divisor(CG, _SUBLANE)
            if d is not None:
                TCG = d

    grid = (B // TB, CG // TCG, n_lt)

    # ---- Pass 1: pooled spatial sums (Pallas) ------------------------------
    def pool_kernel(x_ref, sum_ref):
        li = pl.program_id(2)

        @pl.when(li == 0)
        def _init():
            sum_ref[...] = jnp.zeros_like(sum_ref)

        xv = x_ref[...].astype(jnp.float32)                     # (TB, TCG, TL)
        if k == 1:
            if ragged:                                          # mask OOB lanes
                lane = jax.lax.broadcasted_iota(jnp.int32, xv.shape, 2)
                xv = jnp.where(lane + li * TL < L, xv, 0.0)
            sum_ref[...] += jnp.sum(xv, axis=-1, keepdims=True)
        else:
            # Full-width masked reduce per folded channel; no non-128-aligned
            # lane slicing, single dense store into the (TB, TCG, k) output.
            lane_seg = jax.lax.broadcasted_iota(jnp.int32, xv.shape, 2) // seg
            colk = jax.lax.broadcasted_iota(jnp.int32, (TB, TCG, k), 2)
            acc = jnp.zeros((TB, TCG, k), jnp.float32)
            for i in range(k):
                si = jnp.sum(jnp.where(lane_seg == i, xv, 0.0),
                             axis=-1, keepdims=True)            # (TB, TCG, 1)
                acc = jnp.where(colk == i, si, acc)
            sum_ref[...] += acc

    sums = pl.pallas_call(
        pool_kernel,
        out_shape=jax.ShapeDtypeStruct((B, CG, k), jnp.float32),
        grid=grid,
        in_specs=[pl.BlockSpec((TB, TCG, TL), lambda b, c, l: (b, c, l))],
        out_specs=pl.BlockSpec((TB, TCG, k), lambda b, c, l: (b, c, 0)),
        compiler_params=pltpu.CompilerParams(
            dimension_semantics=("parallel", "parallel", "arbitrary"),
            vmem_limit_bytes=_VMEM_LIMIT),
    )(x3)

    # ---- Pass 2: excitation MLP (tiny; plain JAX, batched over B) ----------
    # HIGHEST precision so the f32 matmuls match PyTorch f32 Linear.
    hi = jax.lax.Precision.HIGHEST
    y = sums.reshape(B, C) * (1.0 / HW)                        # true mean
    z1 = jnp.dot(y, w1.T, precision=hi) + b1
    z1 = jnp.where(z1 > 0, z1, alpha * z1)                     # scalar PReLU
    gate = jax.nn.sigmoid(jnp.dot(z1, w2.T, precision=hi) + b2)
    gate3 = gate.reshape(B, CG, k).astype(jnp.float32)

    # ---- Pass 3: scale x by the per-(b, c) gate (Pallas) -------------------
    # Note: for ragged lane tiles the out-of-bounds padded lanes are read and
    # multiplied too; the block writeback is clipped at the array edge, so
    # this is harmless (no masked stores needed -- keeps vst lane-dense).
    def scale_kernel(x_ref, g_ref, o_ref):
        xv = x_ref[...].astype(jnp.float32)
        g = g_ref[...]                                          # (TB, TCG, k)
        if k == 1:
            o_ref[...] = (xv * g).astype(o_ref.dtype)
        else:
            # Expand the gate to a lane-dense (TB, TCG, TL) value, then do a
            # single full-width store (no seg-wide masked partial stores).
            lane_seg = jax.lax.broadcasted_iota(jnp.int32, xv.shape, 2) // seg
            gate_full = jnp.zeros(xv.shape, jnp.float32)
            for i in range(k):
                gate_full = jnp.where(lane_seg == i, g[:, :, i:i + 1],
                                      gate_full)
            o_ref[...] = (xv * gate_full).astype(o_ref.dtype)

    out3 = pl.pallas_call(
        scale_kernel,
        out_shape=jax.ShapeDtypeStruct((B, CG, L), out_dtype),
        grid=grid,
        in_specs=[pl.BlockSpec((TB, TCG, TL), lambda b, c, l: (b, c, l)),
                  pl.BlockSpec((TB, TCG, k), lambda b, c, l: (b, c, 0))],
        out_specs=pl.BlockSpec((TB, TCG, TL), lambda b, c, l: (b, c, l)),
        compiler_params=pltpu.CompilerParams(
            dimension_semantics=("parallel", "parallel", "parallel"),
            vmem_limit_bytes=_VMEM_LIMIT),
    )(x3, gate3)

    return out3.reshape(B, C, H, W)


# ----------------------------------------------------------------------------
# public entry point
# ----------------------------------------------------------------------------
def se_block_forward(x, w1, b1, alpha, w2, b2, *,
                     max_lane_tile=1024,
                     max_block_bytes=2 * 1024 * 1024,
                     batch_pack_bytes=1024 * 1024,
                     fused_vmem_bytes=4 * 1024 * 1024,
                     out_dtype=None):
    """SE block forward.

    x: (B, C, H, W); w1: (C//r, C); b1: (C//r,); alpha: PReLU scalar
    (nn.PReLU() default, num_parameters=1); w2: (C, C//r); b2: (C,).
    out_dtype=jnp.bfloat16 gives a reduced-writeback variant (accumulation
    and the MLP stay in f32).  Returns (B, C, H, W).
    """
    B, C, H, W = x.shape
    out_dtype = x.dtype if out_dtype is None else out_dtype
    x_bytes = B * C * H * W * x.dtype.itemsize
    # Small-input fast path: keep x resident in VMEM (1 HBM read + 1 write).
    # 4 MiB (-> ~8 MiB with the output) is conservative for all generations,
    # including v7x's 32 MiB scoped / 64 MiB physical VMEM.
    if x_bytes <= fused_vmem_bytes:
        return _se_fused(x, w1, b1, alpha, w2, b2, out_dtype)
    return _se_tiled(x, w1, b1, alpha, w2, b2, out_dtype,
                     max_lane_tile, max_block_bytes, batch_pack_bytes)


# ----------------------------------------------------------------------------
# reference + test
# ----------------------------------------------------------------------------
def _reference(x, w1, b1, alpha, w2, b2):
    hi = jax.lax.Precision.HIGHEST
    y = jnp.mean(x, axis=(2, 3))
    z1 = jnp.dot(y, w1.T, precision=hi) + b1
    z1 = jnp.where(z1 > 0, z1, alpha * z1)
    s = jax.nn.sigmoid(jnp.dot(z1, w2.T, precision=hi) + b2)
    return x * s[:, :, None, None]


def _make_inputs(key, B, C, H, W, reduction):
    Cr = max(C // reduction, 1)
    kx, k1, k2, k3, k4 = jax.random.split(key, 5)
    x = jax.random.normal(kx, (B, C, H, W), dtype=jnp.float32)
    w1 = jax.random.normal(k1, (Cr, C), dtype=jnp.float32) * 0.1
    b1 = jax.random.normal(k2, (Cr,), dtype=jnp.float32) * 0.1
    w2 = jax.random.normal(k3, (C, Cr), dtype=jnp.float32) * 0.1
    b2 = jax.random.normal(k4, (C,), dtype=jnp.float32) * 0.1
    alpha = jnp.float32(0.25)      # PyTorch PReLU default init
    return x, w1, b1, alpha, w2, b2


if __name__ == "__main__":
    key = jax.random.PRNGKey(0)
    k_a, k_b, k_c = jax.random.split(key, 3)

    # Case A: small input -> fused single-call path (x resident in VMEM).
    args_a = _make_inputs(k_a, 2, 64, 8, 8, 16)
    out_a = jax.block_until_ready(se_block_forward(*args_a))
    ref_a = _reference(*args_a)
    assert out_a.shape == (2, 64, 8, 8)
    assert jnp.allclose(out_a, ref_a, atol=1e-4, rtol=1e-4), "case A mismatch"

    # Case B: force the tiled 3-pass path with a small lane tile to exercise
    # the tiled spatial reduction + masked ragged-tail code (k == 1).
    args_b = _make_inputs(k_b, 2, 32, 12, 12, 16)
    out_b = jax.block_until_ready(
        se_block_forward(*args_b, max_lane_tile=128, fused_vmem_bytes=0))
    ref_b = _reference(*args_b)
    assert out_b.shape == (2, 32, 12, 12)
    assert jnp.allclose(out_b, ref_b, atol=1e-5, rtol=1e-5), "case B mismatch"

    # Case C: force the tiled path on a power-of-two feature map to exercise
    # the channel-folding (k == 2) lane-dense pool / scale kernels.
    args_c = _make_inputs(k_c, 2, 64, 8, 8, 16)
    out_c = jax.block_until_ready(
        se_block_forward(*args_c, fused_vmem_bytes=0))
    ref_c = _reference(*args_c)
    assert out_c.shape == (2, 64, 8, 8)
    assert jnp.allclose(out_c, ref_c, atol=1e-5, rtol=1e-5), "case C mismatch"

    print("KERNEL_OK")
</pallas_src>

<mosaic_0001>
module attributes {stable_mosaic.version = 11 : i64} {
  func.func @kernel(%arg0: memref<2x64x64xf32, #tpu.memory_space<vmem>>, %arg1: memref<64x4xf32, #tpu.memory_space<vmem>>, %arg2: memref<1x4xf32, #tpu.memory_space<vmem>>, %arg3: memref<1x1xf32, #tpu.memory_space<vmem>>, %arg4: memref<4x64xf32, #tpu.memory_space<vmem>>, %arg5: memref<1x64xf32, #tpu.memory_space<vmem>>, %arg6: memref<2x64x64xf32, #tpu.memory_space<vmem>>) attributes {dimension_semantics = [], scalar_prefetch = 0 : i64, scratch_operands = 0 : i64, tpu.core_type = #tpu.core_type<tc>} {
    %c0 = arith.constant 0 : index
    %c0_0 = arith.constant 0 : index
    %c0_1 = arith.constant 0 : index
    %0 = vector.load %arg0[%c0, %c0_0, %c0_1] : memref<2x64x64xf32, #tpu.memory_space<vmem>>, vector<2x64x64xf32>
    %cst = arith.constant dense<0.000000e+00> : vector<2x64xf32>
    %1 = vector.multi_reduction <add>, %0, %cst [2] : vector<2x64x64xf32> to vector<2x64xf32>
    %cst_2 = arith.constant 1.562500e-02 : f32
    %2 = vector.broadcast %cst_2 : f32 to vector<2x64xf32>
    %3 = arith.mulf %1, %2 : vector<2x64xf32>
    %4 = vector.shape_cast %3 : vector<2x64xf32> to vector<2x64x1xf32>
    %c0_3 = arith.constant 0 : index
    %c0_4 = arith.constant 0 : index
    %5 = vector.load %arg1[%c0_3, %c0_4] : memref<64x4xf32, #tpu.memory_space<vmem>>, vector<64x4xf32>
    %6 = vector.shape_cast %5 : vector<64x4xf32> to vector<1x64x4xf32>
    %7 = vector.broadcast %4 : vector<2x64x1xf32> to vector<2x64x4xf32>
    %8 = vector.broadcast %6 : vector<1x64x4xf32> to vector<2x64x4xf32>
    %9 = arith.mulf %7, %8 : vector<2x64x4xf32>
    %cst_5 = arith.constant dense<0.000000e+00> : vector<2x4xf32>
    %10 = vector.multi_reduction <add>, %9, %cst_5 [1] : vector<2x64x4xf32> to vector<2x4xf32>
    %c0_6 = arith.constant 0 : index
    %c0_7 = arith.constant 0 : index
    %11 = vector.load %arg2[%c0_6, %c0_7] : memref<1x4xf32, #tpu.memory_space<vmem>>, vector<1x4xf32>
    %12 = vector.broadcast %11 : vector<1x4xf32> to vector<2x4xf32>
    %13 = arith.addf %10, %12 : vector<2x4xf32>
    %cst_8 = arith.constant 0.000000e+00 : f32
    %14 = vector.broadcast %cst_8 : f32 to vector<2x4xf32>
    %15 = arith.cmpf ogt, %13, %14 : vector<2x4xf32>
    %c0_9 = arith.constant 0 : index
    %c0_10 = arith.constant 0 : index
    %16 = vector.load %arg3[%c0_9, %c0_10] : memref<1x1xf32, #tpu.memory_space<vmem>>, vector<1x1xf32>
    %17 = vector.broadcast %16 : vector<1x1xf32> to vector<2x4xf32>
    %18 = arith.mulf %17, %13 : vector<2x4xf32>
    %19 = arith.select %15, %13, %18 : vector<2x4xi1>, vector<2x4xf32>
    %20 = vector.shape_cast %19 : vector<2x4xf32> to vector<2x4x1xf32>
    %c0_11 = arith.constant 0 : index
    %c0_12 = arith.constant 0 : index
    %21 = vector.load %arg4[%c0_11, %c0_12] : memref<4x64xf32, #tpu.memory_space<vmem>>, vector<4x64xf32>
    %22 = vector.shape_cast %21 : vector<4x64xf32> to vector<1x4x64xf32>
    %23 = vector.broadcast %20 : vector<2x4x1xf32> to vector<2x4x64xf32>
    %24 = vector.broadcast %22 : vector<1x4x64xf32> to vector<2x4x64xf32>
    %25 = arith.mulf %23, %24 : vector<2x4x64xf32>
    %cst_13 = arith.constant dense<0.000000e+00> : vector<2x64xf32>
    %26 = vector.multi_reduction <add>, %25, %cst_13 [1] : vector<2x4x64xf32> to vector<2x64xf32>
    %c0_14 = arith.constant 0 : index
    %c0_15 = arith.constant 0 : index
    %27 = vector.load %arg5[%c0_14, %c0_15] : memref<1x64xf32, #tpu.memory_space<vmem>>, vector<1x64xf32>
    %28 = vector.broadcast %27 : vector<1x64xf32> to vector<2x64xf32>
    %29 = arith.addf %26, %28 : vector<2x64xf32>
    %cst_16 = arith.constant 0.000000e+00 : f32
    %30 = vector.broadcast %cst_16 : f32 to vector<2x64xf32>
    %31 = arith.subf %30, %29 : vector<2x64xf32>
    %32 = math.exp %31 : vector<2x64xf32>
    %cst_17 = arith.constant 1.000000e+00 : f32
    %33 = vector.broadcast %cst_17 : f32 to vector<2x64xf32>
    %34 = arith.addf %33, %32 : vector<2x64xf32>
    %cst_18 = arith.constant 1.000000e+00 : f32
    %35 = vector.broadcast %cst_18 : f32 to vector<2x64xf32>
    %36 = arith.divf %35, %34 : vector<2x64xf32>
    %37 = vector.shape_cast %36 : vector<2x64xf32> to vector<2x64x1xf32>
    %38 = vector.broadcast %37 : vector<2x64x1xf32> to vector<2x64x64xf32>
    %39 = arith.mulf %0, %38 : vector<2x64x64xf32>
    %c0_19 = arith.constant 0 : index
    %c0_20 = arith.constant 0 : index
    %c0_21 = arith.constant 0 : index
    %40 = vector.load %arg6[%c0_19, %c0_20, %c0_21] : memref<2x64x64xf32, #tpu.memory_space<vmem>>, vector<2x64x64xf32>
    tpu.vector_store %arg6[%c0_19, %c0_20, %c0_21], %39 {strides = array<i32>} : memref<2x64x64xf32, #tpu.memory_space<vmem>>, vector<2x64x64xf32>,
    return
  }
}

</mosaic_0001>

<bundles_post_ra>
// kernel: tpu_custom_call.1
= control target key start
LH: loop header
LB: loop body
LE: loop exit
PB: predicated region body
PF: predicated region fallthrough
CT: control target
= control target key end

     0   :  { %s668_s0 = inlined_call_operand.hbm [shape: f32[2,64,64], index: 0, kind: input, shape index: {}]   ;;  %s669_s1 = inlined_call_operand.vmem [shape: f32[64,4], index: 1, kind: input, shape index: {}]   ;;  %s670_s2 = inlined_call_operand.vmem [shape: f32[1,4], index: 2, kind: input, shape index: {}]   ;;  %s671_s3 = inlined_call_operand.<no memory space> [shape: f32[1,1], index: 3, kind: input, shape index: {}]   ;;  %s672_s4 = inlined_call_operand.vmem [shape: f32[4,64], index: 4, kind: input, shape index: {}]   ;;  %s673_s5 = inlined_call_operand.vmem [shape: f32[1,64], index: 5, kind: input, shape index: {}]   ;;  %s674_s6 = inlined_call_operand.hbm [shape: f32[2,64,64], index: 6, kind: output, shape index: {}]  }
   0x1   :  { %v11_v0 = vstv %s671_s3 }
   0x2   :  { %12 = vst [vmem:[#allocation2] sm:$0x1] %v11_v0 }
   0x3   :  { %13 = vsyncpa [#allocation4], 0 }
   0x4   :  { %14 = vsyncpa [#allocation5], 0  ;;  %s450_s23 = smov [#allocation3]   ;;  %s402_s27 = scalar_lea.hbm %s668_s0, 2048 }
   0x5   :  { %s20_s24 = sshll.u32 %s450_s23, 4  ;;  %p403_p0 = scmp.ne.s32.totalorder %s668_s0, %s402_s27  ;;  %s21_s24 = int_to_ptr.vmem [resolvable:$true] %s20_s24 }
   0x6   :  { %p406_p1 = scmp.lt.u32.totalorder %s402_s27, %s668_s0 }
   0x8   :  { %p408_p2 = pnand %p406_p1, %p403_p0 }
   0xa   :  { %411 = shalt.err (!%p408_p2)
}
   0xb   :  { %s412_s3 = scalar_lea.vmem %s21_s24, 2048  ;;  %p417_p4 = scmp.lt.s32.totalorder %s21_s24, %s21_s24 }
   0xc   :  { %p413_p3 = scmp.ne.s32.totalorder %s21_s24, %s412_s3  ;;  %p418_p5 = scmp.lt.s32.totalorder %s412_s3, %s412_s3 }
   0xe   :  { %p419_p6 = por %p418_p5, %p417_p4 }
  0x10   :  { %p420_p7 = pnand %p419_p6, %p413_p3 }
  0x12   :  { %423 = shalt.err (!%p420_p7)
}
  0x13   :  { %s451_s8 = smov 128   ;;  %s452_s9 = smov 8  }
  0x14   :  { %26 = dma.hbm_to_vmem [thread:$0]  %s668_s0, 2048, %s21_s24, [#allocation4], %s451_s8, %s451_s8, %s452_s9  }
  0x15   :  { %446 = dma.done.wait [#allocation4], 2048  }
  0x16   :  { %447 = vsyncadd [#allocation4], 4294965248  ;;  %v453_v1 = vmov 0   ;;  %vm56_vm0 = vcmask 523264   ;;  %v508_v2 = vld [vmem:[#allocation3 + $0x40] sm:$0xff]  ;;  %v512_v4 = vld [vmem:[#allocation3 + $0x48] sm:$0xff] }
  0x17   :  { %393 = vset.pattern.permute.xlu0 %v453_v1  ;;  %v510_v3 = vld [vmem:[#allocation3] sm:$0xff]  ;;  %v81_v5 = vsel %vm56_vm0, %v508_v2, 0.0  ;;  %v518_v7 = vld [vmem:[#allocation3 + $0x8] sm:$0xff]  ;;  %v84_v8 = vsel %vm56_vm0, %v512_v4, 0.0  ;;  %v524_v10 = vld [vmem:[#allocation3 + $0x50] sm:$0xff]  ;;  %vm145_vm1 = vcmask 31744  }
  0x18   :  { %v57_v6 = vsel %vm56_vm0, %v510_v3, 0.0  ;;  %82 = vadd.xlane.f32.xlu1 %v81_v5  ;;  %v60_v9 = vsel %vm56_vm0, %v518_v7, 0.0  ;;  %v526_v11 = vld [vmem:[#allocation3 + $0x10] sm:$0xff]  ;;  %v87_v12 = vsel %vm56_vm0, %v524_v10, 0.0  ;;  %v532_v14 = vld [vmem:[#allocation3 + $0x58] sm:$0xff]  ;;  %v540_v18 = vld [vmem:[#allocation3 + $0x60] sm:$0xff] }
  0x19   :  { %58 = vadd.xlane.f32.xlu0 %v57_v6  ;;  %v63_v13 = vsel %vm56_vm0, %v526_v11, 0.0  ;;  %v534_v15 = vld [vmem:[#allocation3 + $0x18] sm:$0xff]  ;;  %v90_v16 = vsel %vm56_vm0, %v532_v14, 0.0  ;;  %v542_v19 = vld [vmem:[#allocation3 + $0x20] sm:$0xff]  ;;  %v93_v20 = vsel %vm56_vm0, %v540_v18, 0.0  ;;  %v548_v22 = vld [vmem:[#allocation3 + $0x68] sm:$0xff] }
  0x1a   :  { %v66_v17 = vsel %vm56_vm0, %v534_v15, 0.0  ;;  %v69_v21 = vsel %vm56_vm0, %v542_v19, 0.0  ;;  %v550_v23 = vld [vmem:[#allocation3 + $0x28] sm:$0xff]  ;;  %v96_v24 = vsel %vm56_vm0, %v548_v22, 0.0  ;;  %v556_v26 = vld [vmem:[#allocation3 + $0x70] sm:$0xff]  ;;  %v564_v30 = vld [vmem:[#allocation3 + $0x78] sm:$0xff] }
  0x1b   :  { %v72_v25 = vsel %vm56_vm0, %v550_v23, 0.0  ;;  %v558_v27 = vld [vmem:[#allocation3 + $0x30] sm:$0xff]  ;;  %v99_v28 = vsel %vm56_vm0, %v556_v26, 0.0  ;;  %v566_v31 = vld [vmem:[#allocation3 + $0x38] sm:$0xff]  ;;  %v102_v32 = vsel %vm56_vm0, %v564_v30, 0.0  ;;  %v122_v43 = vld [vmem:[%s669_s1 + $0x8] sm:$0xff] }
  0x1c   :  { %85 = vadd.xlane.f32.xlu1 %v84_v8  ;;  %v75_v29 = vsel %vm56_vm0, %v558_v27, 0.0  ;;  %v78_v33 = vsel %vm56_vm0, %v566_v31, 0.0  ;;  %v386_v34 = vld [vmem:[#allocation2] ss:$0 sm:$0xff]  ;;  %v123_v51 = vld [vmem:[%s669_s1 + $0x10] sm:$0xff]  ;;  %v124_v61 = vld [vmem:[%s669_s1 + $0x18] sm:$0xff] }
  0x1d   :  { %61 = vadd.xlane.f32.xlu0 %v60_v9  ;;  %v121_v38 = vld [vmem:[%s669_s1] sm:$0xff]  ;;  %vm230_vm4 = vcmask 519168  }
  0x20   :  { %88 = vadd.xlane.f32.xlu1 %v87_v12 }
  0x21   :  { %64 = vadd.xlane.f32.xlu0 %v63_v13 }
  0x24   :  { %91 = vadd.xlane.f32.xlu1 %v90_v16 }
  0x25   :  { %67 = vadd.xlane.f32.xlu0 %v66_v17  ;;  %v125_v17 = vld [vmem:[%s669_s1 + $0x20] sm:$0xff] }
  0x28   :  { %94 = vadd.xlane.f32.xlu1 %v93_v20 }
  0x29   :  { %70 = vadd.xlane.f32.xlu0 %v69_v21 }
  0x2c   :  { %97 = vadd.xlane.f32.xlu1 %v96_v24 }
  0x2d   :  { %73 = vadd.xlane.f32.xlu0 %v72_v25 }
  0x30   :  { %100 = vadd.xlane.f32.xlu1 %v99_v28 }
  0x31   :  { %76 = vadd.xlane.f32.xlu0 %v75_v29  ;;  %v126_v29 = vld [vmem:[%s669_s1 + $0x28] sm:$0xff] }
  0x34   :  { %103 = vadd.xlane.f32.xlu1 %v102_v32 }
  0x35   :  { %79 = vadd.xlane.f32.xlu0 %v78_v33 }
  0x4b   :  { %206 = vperm.xlu0 %393, %v386_v34  }
  0xa5   :  { %v83_v35 = vpop.xlane.xlu1 %82 }
  0xa6   :  { %v59_v36 = vpop.xlane.xlu0 %58  ;;  %v113_v37 = vmul.f32 0.015625, %v83_v35 }
  0xa7   :  { %v105_v54 = vmul.f32 0.015625, %v59_v36 }
  0xa8   :  { %v137_v39 = vmul.f32 %v121_v38, %v113_v37 }
  0xa9   :  { %v86_v40 = vpop.xlane.xlu1 %85  ;;  %v129_v1 = vmul.f32 %v121_v38, %v105_v54 }
  0xaa   :  { %v62_v41 = vpop.xlane.xlu0 %61  ;;  %v114_v42 = vmul.f32 0.015625, %v86_v40  ;;  %v167_v44 = vsel %vm145_vm1, %v137_v39, 0.0 }
  0xab   :  { %v106_v52 = vmul.f32 0.015625, %v62_v41  ;;  %v146_v25 = vsel %vm145_vm1, %v129_v1, 0.0 }
  0xac   :  { %v138_v45 = vmul.f32 %v122_v43, %v114_v42 }
  0xad   :  { %v89_v46 = vpop.xlane.xlu1 %88  ;;  %v130_v62 = vmul.f32 %v122_v43, %v106_v52 }
  0xae   :  { %v65_v47 = vpop.xlane.xlu0 %64  ;;  %v168_v48 = vsel %vm145_vm1, %v138_v45, 0.0  ;;  %v115_v49 = vmul.f32 0.015625, %v89_v46 }
  0xaf   :  { %v169_v50 = vadd.f32 %v168_v48, %v167_v44  ;;  %v107_v55 = vmul.f32 0.015625, %v65_v47  ;;  %v147_v20 = vsel %vm145_vm1, %v130_v62, 0.0  ;;  %v127_v44 = vld [vmem:[%s669_s1 + $0x30] sm:$0xff] }
  0xb0   :  { %v139_v53 = vmul.f32 %v123_v51, %v115_v49  ;;  %v148_v38 = vadd.f32 %v147_v20, %v146_v25 }
  0xb1   :  { %v92_v56 = vpop.xlane.xlu1 %91  ;;  %v131_v5 = vmul.f32 %v123_v51, %v107_v55 }
  0xb2   :  { %v68_v57 = vpop.xlane.xlu0 %67  ;;  %v170_v58 = vsel %vm145_vm1, %v139_v53, 0.0  ;;  %v116_v59 = vmul.f32 0.015625, %v92_v56 }
  0xb3   :  { %v171_v60 = vadd.f32 %v170_v58, %v169_v50  ;;  %v108_v0 = vmul.f32 0.015625, %v68_v57  ;;  %v149_v28 = vsel %vm145_vm1, %v131_v5, 0.0  ;;  %v128_v57 = vld [vmem:[%s669_s1 + $0x38] sm:$0xff] }
  0xb4   :  { %v140_v63 = vmul.f32 %v124_v61, %v116_v59  ;;  %v150_v43 = vadd.f32 %v149_v28, %v148_v38 }
  0xb5   :  { %v95_v6 = vpop.xlane.xlu1 %94  ;;  %v132_v21 = vmul.f32 %v124_v61, %v108_v0 }
  0xb6   :  { %v71_v8 = vpop.xlane.xlu0 %70  ;;  %v172_v9 = vsel %vm145_vm1, %v140_v63, 0.0  ;;  %v117_v12 = vmul.f32 0.015625, %v95_v6 }
  0xb7   :  { %v109_v13 = vmul.f32 0.015625, %v71_v8  ;;  %v173_v16 = vadd.f32 %v172_v9, %v171_v60  ;;  %v151_v40 = vsel %vm145_vm1, %v132_v21, 0.0 }
  0xb8   :  { %v141_v24 = vmul.f32 %v125_v17, %v117_v12  ;;  %v152_v51 = vadd.f32 %v151_v40, %v150_v43 }
  0xb9   :  { %v98_v32 = vpop.xlane.xlu1 %97  ;;  %v133_v35 = vmul.f32 %v125_v17, %v109_v13 }
  0xba   :  { %v74_v33 = vpop.xlane.xlu0 %73  ;;  %v174_v34 = vsel %vm145_vm1, %v141_v24, 0.0  ;;  %v118_v36 = vmul.f32 0.015625, %v98_v32 }
  0xbb   :  { %v110_v37 = vmul.f32 0.015625, %v74_v33  ;;  %v175_v39 = vadd.f32 %v174_v34, %v173_v16  ;;  %v153_v47 = vsel %vm145_vm1, %v133_v35, 0.0 }
  0xbc   :  { %v142_v41 = vmul.f32 %v126_v29, %v118_v36  ;;  %v154_v56 = vadd.f32 %v153_v47, %v152_v51  ;;  %v385_v36 = vld [vmem:[%s670_s2] ss:$0 sm:$0xff] }
  0xbd   :  { %v134_v42 = vmul.f32 %v126_v29, %v110_v37  ;;  %v101_v45 = vpop.xlane.xlu1 %100  ;;  %v213_v29 = vlaneseq }
  0xbe   :  { %v77_v46 = vpop.xlane.xlu0 %76  ;;  %v176_v48 = vsel %vm145_vm1, %v142_v41, 0.0  ;;  %v119_v49 = vmul.f32 0.015625, %v101_v45 }
  0xbf   :  { %v111_v50 = vmul.f32 0.015625, %v77_v46  ;;  %v177_v52 = vadd.f32 %v176_v48, %v175_v39  ;;  %v155_v53 = vsel %vm145_vm1, %v134_v42, 0.0  ;;  %v214_v37 = vshrl.u32 %v213_v29, 7 }
  0xc0   :  { %v143_v54 = vmul.f32 %v127_v44, %v119_v49  ;;  %v156_v0 = vadd.f32 %v155_v53, %v154_v56 }
  0xc1   :  { %v135_v55 = vmul.f32 %v127_v44, %v111_v50  ;;  %v104_v58 = vpop.xlane.xlu1 %103  ;;  %v215_v43 = vsub.s32 0, %v214_v37  ;;  %v227_v50 = vld [vmem:[%s672_s4] sm:$0xf]  ;;  %s454_s4 = smov [#allocation6]  }
  0xc2   :  { %v80_v59 = vpop.xlane.xlu0 %79  ;;  %v178_v60 = vsel %vm145_vm1, %v143_v54, 0.0  ;;  %v120_v62 = vmul.f32 0.015625, %v104_v58 }
  0xc3   :  { %v157_v61 = vsel %vm145_vm1, %v135_v55, 0.0  ;;  %v112_v63 = vmul.f32 0.015625, %v80_v59  ;;  %v179_v1 = vadd.f32 %v178_v60, %v177_v52 }
  0xc4   :  { %v144_v5 = vmul.f32 %v128_v57, %v120_v62  ;;  %v158_v8 = vadd.f32 %v157_v61, %v156_v0 }
  0xc5   :  { %v136_v6 = vmul.f32 %v128_v57, %v112_v63 }
  0xc6   :  { %v180_v9 = vsel %vm145_vm1, %v144_v5, 0.0 }
  0xc7   :  { %v159_v12 = vsel %vm145_vm1, %v136_v6, 0.0  ;;  %v181_v13 = vadd.f32 %v180_v9, %v179_v1  ;;  %v387_v1 = vld [vmem:[%s673_s5] ss:$0 sm:$0xff]  ;;  %s373_s5 = sshll.u32 %s454_s4, 4  ;;  %s374_s5 = int_to_ptr.vmem [resolvable:$true] %s373_s5 }
  0xc8   :  { %v160_v16 = vadd.f32 %v159_v12, %v158_v8  ;;  %s424_s7 = scalar_lea.vmem %s374_s5, 2048  ;;  %p429_p9 = scmp.lt.s32.totalorder %s374_s5, %s374_s5 }
  0xc9   :  { %v182_v17 = vrot.slane %v181_v13, 4  ;;  %p425_p8 = scmp.ne.s32.totalorder %s374_s5, %s424_s7  ;;  %p430_p10 = scmp.lt.s32.totalorder %s424_s7, %s424_s7 }
  0xca   :  { %v161_v20 = vrot.slane %v160_v16, 4  ;;  %v207_v40 = vpop.permute.xlu0 %206 }
  0xcb   :  { %v183_v21 = vadd.f32 %v182_v17, %v181_v13  ;;  %p431_p11 = por %p430_p10, %p429_p9 }
  0xcc   :  { %v162_v24 = vadd.f32 %v161_v20, %v160_v16 }
  0xcd   :  { %v184_v25 = vrot.slane %v183_v21, 2  ;;  %p432_p12 = pnand %p431_p11, %p425_p8 }
  0xce   :  { %v163_v28 = vrot.slane %v162_v24, 2 }
  0xcf   :  { %v185_v32 = vadd.f32 %v184_v25, %v183_v21 }
  0xd0   :  { %v164_v33 = vadd.f32 %v163_v28, %v162_v24 }
  0xd1   :  { %v186_v35 = vrot.slane %v185_v32, 1 }
  0xd2   :  { %v165_v34 = vrot.slane %v164_v33, 1 }
  0xd3   :  { %v187_v39 = vadd.f32 %v186_v35, %v185_v32 }
  0xd4   :  { %v166_v38 = vadd.f32 %v165_v34, %v164_v33 }
  0xd5   :  { %v196_v42 = vadd.f32 %v385_v36, %v187_v39 }
  0xd6   :  { %v195_v41 = vadd.f32 %v385_v36, %v166_v38 }
  0xd7   :  { %v210_v45 = vmul.f32 %v207_v40, %v196_v42  ;;  %vm198_vm3 = vcmp.gt.f32.partialorder %v196_v42, 0.0 }
  0xd8   :  { %v209_v44 = vmul.f32 %v207_v40, %v195_v41  ;;  %vm197_vm2 = vcmp.gt.f32.partialorder %v195_v41, 0.0 }
  0xd9   :  { %v212_v48 = vsel %vm198_vm3, %v196_v42, %v210_v45 }
  0xda   :  { %v211_v46 = vsel %vm197_vm2, %v195_v41, %v209_v44  ;;  %v223_v49 = vrot.slane %v212_v48, %v215_v43 }
  0xdb   :  { %v216_v47 = vrot.slane %v211_v46, %v215_v43 }
  0xdd   :  { %218 = vbcast.lane.b32.xlu1 %v216_v47, 256 }
  0xe1   :  { %225 = vbcast.lane.b32.xlu1 %v223_v49, 256 }
 0x14f   :  { %v219_v51 = vpop.permute.xlu1 %218 }
 0x150   :  { %v228_v52 = vmul.f32 %v227_v50, %v219_v51 }
 0x152   :  { %v231_v53 = vsel %vm230_vm4, %v228_v52, 0.0 }
 0x153   :  { %v232_v54 = vrot.slane %v231_v53, 4  ;;  %v226_v55 = vpop.permute.xlu1 %225 }
 0x154   :  { %v229_v56 = vmul.f32 %v227_v50, %v226_v55 }
 0x155   :  { %v233_v57 = vadd.f32 %v232_v54, %v231_v53 }
 0x156   :  { %v238_v58 = vsel %vm230_vm4, %v229_v56, 0.0 }
 0x157   :  { %v234_v59 = vrot.slane %v233_v57, 2  ;;  %v239_v60 = vrot.slane %v238_v58, 4 }
 0x159   :  { %v235_v61 = vadd.f32 %v234_v59, %v233_v57  ;;  %v240_v62 = vadd.f32 %v239_v60, %v238_v58 }
 0x15b   :  { %v236_v63 = vrot.slane %v235_v61, 1  ;;  %v241_v0 = vrot.slane %v240_v62, 2 }
 0x15d   :  { %v237_v5 = vadd.f32 %v236_v63, %v235_v61  ;;  %v242_v6 = vadd.f32 %v241_v0, %v240_v62 }
 0x15f   :  { %v252_v8 = vadd.f32 %v387_v1, %v237_v5  ;;  %v243_v9 = vrot.slane %v242_v6, 1 }
 0x161   :  { %v254_v12 = vsub.f32 0.0, %v252_v8  ;;  %v244_v13 = vadd.f32 %v243_v9, %v242_v6 }
 0x163   :  { %v256_v16 = vmul.f32 1.442695, %v254_v12  ;;  %v253_v17 = vadd.f32 %v387_v1, %v244_v13 }
 0x165   :  { %394 = vpow2.f32 %v256_v16  ;;  %v255_v20 = vsub.f32 0.0, %v253_v17 }
 0x167   :  { %v258_v21 = vmul.f32 1.442695, %v255_v20 }
 0x169   :  { %396 = vpow2.f32 %v258_v21 }
 0x16f   :  { %v395_v24 = vpop.eup %394 }
 0x170   :  { %v260_v25 = vadd.f32 1.0, %v395_v24 }
 0x172   :  { %398 = vrcp.f32 %v260_v25 }
 0x173   :  { %v397_v28 = vpop.eup %396 }
 0x174   :  { %v261_v29 = vadd.f32 1.0, %v397_v28 }
 0x176   :  { %400 = vrcp.f32 %v261_v29 }
 0x17c   :  { %v399_v32 = vpop.eup %398 }
 0x17d   :  { %v269_v33 = vrot.slane %v399_v32, %v215_v43 }
 0x17f   :  { %295 = vbcast.lane.b32.xlu0 %v269_v33, 304  ;;  %271 = vbcast.lane.b32.xlu1 %v269_v33, 256 }
 0x180   :  { %v401_v34 = vpop.eup %400 }
 0x181   :  { %v304_v35 = vrot.slane %v401_v34, %v215_v43 }
 0x183   :  { %275 = vbcast.lane.b32.xlu1 %v269_v33, 264  ;;  %306 = vbcast.lane.b32.xlu0 %v304_v35, 256 }
 0x187   :  { %279 = vbcast.lane.b32.xlu1 %v269_v33, 272  ;;  %314 = vbcast.lane.b32.xlu0 %v304_v35, 272 }
 0x18b   :  { %283 = vbcast.lane.b32.xlu1 %v269_v33, 280  ;;  %322 = vbcast.lane.b32.xlu0 %v304_v35, 288 }
 0x18f   :  { %287 = vbcast.lane.b32.xlu1 %v269_v33, 288  ;;  %330 = vbcast.lane.b32.xlu0 %v304_v35, 304 }
 0x193   :  { %291 = vbcast.lane.b32.xlu1 %v269_v33, 296 }
 0x197   :  { %299 = vbcast.lane.b32.xlu1 %v269_v33, 312 }
 0x19b   :  { %310 = vbcast.lane.b32.xlu1 %v304_v35, 264 }
 0x19f   :  { %318 = vbcast.lane.b32.xlu1 %v304_v35, 280 }
 0x1a3   :  { %326 = vbcast.lane.b32.xlu1 %v304_v35, 296 }
 0x1a7   :  { %334 = vbcast.lane.b32.xlu1 %v304_v35, 312 }
 0x1f1   :  { %v296_v36 = vpop.permute.xlu0 %295  ;;  %v272_v37 = vpop.permute.xlu1 %271 }
 0x1f2   :  { %v342_v38 = vmul.f32 %v296_v36, %v558_v27  ;;  %v336_v39 = vmul.f32 %v272_v37, %v510_v3 }
 0x1f4   :  { %358 = vst.msk [vmem:[#allocation6 + $0x30] sm:$0xff] %vm56_vm0, %v342_v38  ;;  %352 = vst.msk [vmem:[#allocation6] sm:$0xff] %vm56_vm0, %v336_v39 }
 0x1f5   :  { %v307_v40 = vpop.permute.xlu0 %306  ;;  %v276_v41 = vpop.permute.xlu1 %275 }
 0x1f6   :  { %v344_v42 = vmul.f32 %v307_v40, %v508_v2  ;;  %v337_v43 = vmul.f32 %v276_v41, %v518_v7 }
 0x1f8   :  { %360 = vst.msk [vmem:[#allocation6 + $0x40] sm:$0xff] %vm56_vm0, %v344_v42  ;;  %353 = vst.msk [vmem:[#allocation6 + $0x8] sm:$0xff] %vm56_vm0, %v337_v43 }
 0x1f9   :  { %v315_v44 = vpop.permute.xlu0 %314  ;;  %v280_v45 = vpop.permute.xlu1 %279 }
 0x1fa   :  { %v346_v27 = vmul.f32 %v315_v44, %v524_v10  ;;  %v338_v3 = vmul.f32 %v280_v45, %v526_v11 }
 0x1fc   :  { %362 = vst.msk [vmem:[#allocation6 + $0x50] sm:$0xff] %vm56_vm0, %v346_v27  ;;  %354 = vst.msk [vmem:[#allocation6 + $0x10] sm:$0xff] %vm56_vm0, %v338_v3 }
 0x1fd   :  { %v323_v46 = vpop.permute.xlu0 %322  ;;  %v284_v47 = vpop.permute.xlu1 %283 }
 0x1fe   :  { %v348_v2 = vmul.f32 %v323_v46, %v540_v18  ;;  %v339_v7 = vmul.f32 %v284_v47, %v534_v15 }
 0x200   :  { %364 = vst.msk [vmem:[#allocation6 + $0x60] sm:$0xff] %vm56_vm0, %v348_v2  ;;  %355 = vst.msk [vmem:[#allocation6 + $0x18] sm:$0xff] %vm56_vm0, %v339_v7 }
 0x201   :  { %v331_v48 = vpop.permute.xlu0 %330  ;;  %v288_v49 = vpop.permute.xlu1 %287 }
 0x202   :  { %v350_v10 = vmul.f32 %v331_v48, %v556_v26  ;;  %v340_v11 = vmul.f32 %v288_v49, %v542_v19 }
 0x204   :  { %366 = vst.msk [vmem:[#allocation6 + $0x70] sm:$0xff] %vm56_vm0, %v350_v10  ;;  %356 = vst.msk [vmem:[#allocation6 + $0x20] sm:$0xff] %vm56_vm0, %v340_v11 }
 0x205   :  { %v292_v50 = vpop.permute.xlu1 %291 }
 0x206   :  { %v341_v51 = vmul.f32 %v292_v50, %v550_v23 }
 0x208   :  { %357 = vst.msk [vmem:[#allocation6 + $0x28] sm:$0xff] %vm56_vm0, %v341_v51 }
 0x209   :  { %v300_v15 = vpop.permute.xlu1 %299 }
 0x20a   :  { %v343_v18 = vmul.f32 %v300_v15, %v566_v31 }
 0x20c   :  { %359 = vst.msk [vmem:[#allocation6 + $0x38] sm:$0xff] %vm56_vm0, %v343_v18 }
 0x20d   :  { %v311_v52 = vpop.permute.xlu1 %310 }
 0x20e   :  { %v345_v53 = vmul.f32 %v311_v52, %v512_v4 }
 0x210   :  { %361 = vst.msk [vmem:[#allocation6 + $0x48] sm:$0xff] %vm56_vm0, %v345_v53 }
 0x211   :  { %v319_v19 = vpop.permute.xlu1 %318 }
 0x212   :  { %v347_v26 = vmul.f32 %v319_v19, %v532_v14 }
 0x214   :  { %363 = vst.msk [vmem:[#allocation6 + $0x58] sm:$0xff] %vm56_vm0, %v347_v26 }
 0x215   :  { %v327_v54 = vpop.permute.xlu1 %326 }
 0x216   :  { %v349_v23 = vmul.f32 %v327_v54, %v548_v22 }
 0x218   :  { %365 = vst.msk [vmem:[#allocation6 + $0x68] sm:$0xff] %vm56_vm0, %v349_v23 }
 0x219   :  { %v335_v31 = vpop.permute.xlu1 %334 }
 0x21a   :  { %v351_v55 = vmul.f32 %v335_v31, %v564_v30 }
 0x21c   :  { %367 = vst.msk [vmem:[#allocation6 + $0x78] sm:$0xff] %vm56_vm0, %v351_v55 }
 0x21d   :  { %435 = shalt.err (!%p432_p12)
}
 0x21e   :  { %s436_s11 = scalar_lea.hbm %s674_s6, 2048 }
 0x21f   :  { %p437_p13 = scmp.ne.s32.totalorder %s674_s6, %s436_s11  ;;  %p440_p0 = scmp.lt.u32.totalorder %s436_s11, %s674_s6 }
 0x221   :  { %p442_p1 = pnand %p440_p0, %p437_p13 }
 0x223   :  { %445 = shalt.err (!%p442_p1)
}
 0x224   :  { %379 = dma.vmem_to_hbm [thread:$0]  %s374_s5, 2048, %s674_s6, [#allocation5], %s451_s8, %s451_s8, %s452_s9  }
 0x225   :  { %448 = dma.done.wait [#allocation5], 2048  }
 0x226   :  { %449 = vsyncadd [#allocation5], 4294965248 }
 0x227   :  { %383 = vsyncpa [#allocation4], 1 }
 0x228   :  { %384 = vsyncpa [#allocation5], 1 }

</bundles_post_ra>
